<compile_context>
chip_gen: v6e
topology: v6e:2x2x1
jax: 0.10.0
libtpu: 0.0.40
codegen_flags: <defaults>
</compile_context>

<pallas_src>
import functools

import jax
import jax.numpy as jnp
from jax.experimental import pallas as pl
from jax.experimental.pallas import tpu as pltpu


def _round_up(x, m):
    return (x + m - 1) // m * m


def _pick_tk(k_pad):
    """Largest K tile: collapse K to one step when it fits, else a big divisor."""
    if k_pad <= 2048:
        return k_pad
    for cand in (2048, 1024, 512, 256, 128):
        if k_pad % cand == 0:
            return cand
    return 128  # unreachable: k_pad is always a multiple of 128


def _linear_kernel_single(x_ref, w_ref, b_ref, o_ref):
    """Single K step: one dot + bias + lane-dense store.

    x_ref : (TM, K_pad) f32  activations (cast to bf16 in-kernel)
    w_ref : (K_pad, TN) bf16 pre-transposed weight
    b_ref : (1,  TN)    f32  bias
    o_ref : (TM, TN)    f32  output
    """
    o_ref[...] = (
        jnp.dot(x_ref[...].astype(jnp.bfloat16), w_ref[...],
                preferred_element_type=jnp.float32)
        + b_ref[...]
    ).astype(o_ref.dtype)


def _linear_kernel_multi(x_ref, w_ref, b_ref, o_ref):
    """K-tiled path: accumulate directly into the resident o_ref block.

    The output block index ignores k, so o_ref stays in VMEM across the K
    axis.  Seeding it with the bias at k==0 removes any finalize phase.
    """
    k = pl.program_id(2)

    @pl.when(k == 0)
    def _():
        o_ref[...] = jnp.broadcast_to(b_ref[...], o_ref.shape).astype(o_ref.dtype)

    o_ref[...] += jnp.dot(x_ref[...].astype(jnp.bfloat16), w_ref[...],
                          preferred_element_type=jnp.float32)


def prepare_linear_params(weight, bias):
    """One-time parameter prep (amortized over every forward call).

    weight : (num_outputs, num_inputs) f32  -- PyTorch nn.Linear layout
    bias   : (num_outputs,)            f32
    returns: w_p (K_pad, N_pad) bf16 pre-transposed, b_p (1, N_pad) f32
    """
    num_outputs, num_inputs = weight.shape
    n_pad = _round_up(num_outputs, 128)
    k_pad = _round_up(num_inputs, 128)
    w_p = jnp.pad(weight.T.astype(jnp.bfloat16),
                  ((0, k_pad - num_inputs), (0, n_pad - num_outputs)))
    b_p = jnp.pad(bias.astype(jnp.float32),
                  (0, n_pad - num_outputs)).reshape(1, n_pad)
    return w_p, b_p


@functools.partial(jax.jit, static_argnames=("num_outputs",))
def linear_net_forward(x, w_p, b_p, *, num_outputs):
    """y = flatten(x) @ weight.T + bias, with pre-prepared (K,N) weight."""
    B = x.shape[0]
    x2d = x.reshape(B, -1)                       # x.view(x.shape[0], -1)
    num_inputs = x2d.shape[1]

    k_pad, n_pad = w_p.shape
    assert k_pad == _round_up(num_inputs, 128), "weight/input K mismatch"

    # ---- tile plan ------------------------------------------------------
    TM = 128 if B > 128 else _round_up(B, 8)     # megacore-friendly for big B
    TN = 256 if n_pad % 256 == 0 else 128        # fill 256-wide MXU when possible
    TK = _pick_tk(k_pad)

    M_pad = _round_up(B, TM)
    x_p = jnp.pad(x2d.astype(jnp.float32),
                  ((0, M_pad - B), (0, k_pad - num_inputs)))

    grid_m, grid_n, grid_k = M_pad // TM, n_pad // TN, k_pad // TK

    # ---- VMEM budget from the real footprint (double-buffered tiles) ----
    vmem_need = (2 * (TM * TK * 4 + TK * TN * 2 + TN * 4)   # x(f32), w(bf16), bias
                 + 2 * TM * TN * 4                          # output tile
                 + (2 << 20))                               # Mosaic slack
    vmem_limit = min(max(_round_up(vmem_need, 1 << 20), 16 << 20), 48 << 20)

    cost = pl.CostEstimate(
        flops=2 * M_pad * n_pad * k_pad,
        transcendentals=0,
        bytes_accessed=(x_p.size * 4 + w_p.size * 2 + b_p.size * 4
                        + M_pad * n_pad * 4))

    if grid_k == 1:
        kernel = _linear_kernel_single
        grid = (grid_m, grid_n)
        in_specs = [
            pl.BlockSpec((TM, TK), lambda i, j: (i, 0)),    # activations
            pl.BlockSpec((TK, TN), lambda i, j: (0, j)),    # weight (K,N)
            pl.BlockSpec((1, TN), lambda i, j: (0, j)),     # bias
        ]
        out_specs = pl.BlockSpec((TM, TN), lambda i, j: (i, j))
        dims = ("parallel", "parallel")
    else:
        kernel = _linear_kernel_multi
        grid = (grid_m, grid_n, grid_k)
        in_specs = [
            pl.BlockSpec((TM, TK), lambda i, j, k: (i, k)),
            pl.BlockSpec((TK, TN), lambda i, j, k: (k, j)),
            pl.BlockSpec((1, TN), lambda i, j, k: (0, j)),
        ]
        out_specs = pl.BlockSpec((TM, TN), lambda i, j, k: (i, j))
        dims = ("parallel", "parallel", "arbitrary")

    out = pl.pallas_call(
        kernel,
        out_shape=jax.ShapeDtypeStruct((M_pad, n_pad), jnp.float32),
        grid_spec=pltpu.PrefetchScalarGridSpec(
            num_scalar_prefetch=0,
            grid=grid,
            in_specs=in_specs,
            out_specs=out_specs,
        ),
        compiler_params=pltpu.CompilerParams(
            dimension_semantics=dims,
            vmem_limit_bytes=vmem_limit),
        cost_estimate=cost,
    )(x_p, w_p, b_p)

    # Slice the lane-dense padded slab back to the true (B, num_outputs).
    return out[:B, :num_outputs]


if __name__ == "__main__":
    # Small shapes consistent with the module: flatten NCHW -> num_inputs.
    B, C, H, W = 2, 4, 16, 16
    num_inputs = C * H * W            # 1024
    num_outputs = 10                  # softmax-regression classes

    key = jax.random.PRNGKey(0)
    kx, kw, kb = jax.random.split(key, 3)

    x = jax.random.normal(kx, (B, C, H, W), dtype=jnp.float32)

    # Deterministic parameter init (PyTorch-default-style uniform bound).
    bound = 1.0 / (num_inputs ** 0.5)
    weight = jax.random.uniform(
        kw, (num_outputs, num_inputs), minval=-bound, maxval=bound,
        dtype=jnp.float32)
    bias = jax.random.uniform(
        kb, (num_outputs,), minval=-bound, maxval=bound, dtype=jnp.float32)

    # One-time parameter prep (transpose/pad/cast), then the jitted forward.
    w_p, b_p = prepare_linear_params(weight, bias)
    y = linear_net_forward(x, w_p, b_p, num_outputs=num_outputs)
    y = jax.block_until_ready(y)
    assert y.shape == (B, num_outputs)

    # Reference 1: same bf16-operand / f32-accumulate recipe as the kernel.
    x2d = x.reshape(B, -1)
    y_ref_bf16 = jnp.dot(x2d.astype(jnp.bfloat16),
                         weight.astype(jnp.bfloat16).T,
                         preferred_element_type=jnp.float32) + bias
    assert jnp.allclose(y, y_ref_bf16, atol=1e-3, rtol=1e-3)

    # Reference 2: full f32 math (loose tolerance for the bf16 operand cast).
    y_ref_f32 = x2d @ weight.T + bias
    assert jnp.allclose(y, y_ref_f32, atol=5e-2, rtol=5e-2)

    print("KERNEL_OK")
</pallas_src>

<mosaic_0001>
module attributes {stable_mosaic.version = 11 : i64} {
  func.func @_linear_kernel_single(%arg0: i32, %arg1: i32, %arg2: memref<8x1024xf32, #tpu.memory_space<vmem>>, %arg3: memref<1024x128xbf16, #tpu.memory_space<vmem>>, %arg4: memref<1x128xf32, #tpu.memory_space<vmem>>, %arg5: memref<8x128xf32, #tpu.memory_space<vmem>>) attributes {dimension_semantics = [#tpu.dimension_semantics<parallel>, #tpu.dimension_semantics<parallel>], iteration_bounds = array<i64: 1, 1>, scalar_prefetch = 0 : i64, scratch_operands = 0 : i64, tpu.core_type = #tpu.core_type<tc>, window_params = [{transform_indices = @transform_0, window_bounds = array<i64: 8, 1024>}, {transform_indices = @transform_1, window_bounds = array<i64: 1024, 128>}, {transform_indices = @transform_2, window_bounds = array<i64: 1, 128>}, {transform_indices = @transform_3, window_bounds = array<i64: 8, 128>}]} {
    %c0 = arith.constant 0 : index
    %c0_0 = arith.constant 0 : index
    %0 = vector.load %arg2[%c0, %c0_0] : memref<8x1024xf32, #tpu.memory_space<vmem>>, vector<8x1024xf32>
    %1 = arith.truncf %0 : vector<8x1024xf32> to vector<8x1024xbf16>
    %c0_1 = arith.constant 0 : index
    %c0_2 = arith.constant 0 : index
    %2 = vector.load %arg3[%c0_1, %c0_2] : memref<1024x128xbf16, #tpu.memory_space<vmem>>, vector<1024x128xbf16>
    %cst = arith.constant dense<0.000000e+00> : vector<8x128xf32>
    %3 = tpu.matmul %1, %2, %cst {dimension_numbers = #tpu.dot_dimension_numbers<[1], [0], [0], [1], [0, 0, 1, 1], [], []>} : vector<8x1024xbf16>, vector<1024x128xbf16>, vector<8x128xf32> -> vector<8x128xf32>
    %c0_3 = arith.constant 0 : index
    %c0_4 = arith.constant 0 : index
    %4 = vector.load %arg4[%c0_3, %c0_4] : memref<1x128xf32, #tpu.memory_space<vmem>>, vector<1x128xf32>
    %5 = vector.broadcast %4 : vector<1x128xf32> to vector<8x128xf32>
    %6 = arith.addf %3, %5 : vector<8x128xf32>
    %c0_5 = arith.constant 0 : index
    %c0_6 = arith.constant 0 : index
    %7 = vector.load %arg5[%c0_5, %c0_6] : memref<8x128xf32, #tpu.memory_space<vmem>>, vector<8x128xf32>
    tpu.vector_store %arg5[%c0_5, %c0_6], %6 {strides = array<i32>} : memref<8x128xf32, #tpu.memory_space<vmem>>, vector<8x128xf32>,
    return
  }
  func.func @transform_0(%arg0: i32, %arg1: i32) -> (i32, i32) {
    %c0_i32 = arith.constant 0 : i32
    %c0_i32_0 = arith.constant 0 : i32
    return %arg0, %c0_i32 : i32, i32
  }
  func.func @transform_1(%arg0: i32, %arg1: i32) -> (i32, i32) {
    %c0_i32 = arith.constant 0 : i32
    %c0_i32_0 = arith.constant 0 : i32
    return %c0_i32, %arg1 : i32, i32
  }
  func.func @transform_2(%arg0: i32, %arg1: i32) -> (i32, i32) {
    %c0_i32 = arith.constant 0 : i32
    %c0_i32_0 = arith.constant 0 : i32
    return %c0_i32, %arg1 : i32, i32
  }
  func.func @transform_3(%arg0: i32, %arg1: i32) -> (i32, i32) {
    %c0_i32 = arith.constant 0 : i32
    return %arg0, %arg1 : i32, i32
  }
}

</mosaic_0001>

<bundles_post_ra>
// kernel: linear_net_forward.1
= control target key start
LH: loop header
LB: loop body
LE: loop exit
PB: predicated region body
PF: predicated region fallthrough
CT: control target
= control target key end

     0   :  { %8 = vsyncpa [#allocation3], 0  ;;  %s972_s12 = smov [#allocation2]   ;;  %s1028_s0 = inlined_call_operand.vmem [shape: f32[8,1024], index: 0, kind: input, shape index: {}]   ;;  %s1029_s1 = inlined_call_operand.hbm [shape: bf16[1024,128], index: 1, kind: input, shape index: {}]   ;;  %s1030_s2 = inlined_call_operand.vmem [shape: f32[1,128], index: 2, kind: input, shape index: {}]   ;;  %s1031_s3 = inlined_call_operand.vmem [shape: f32[8,128], index: 3, kind: output, shape index: {}]  }
   0x1   :  { %s16_s13 = sshll.u32 %s972_s12, 4  ;;  %s17_s13 = int_to_ptr.vmem [resolvable:$true] %s16_s13 }
   0x2   :  { %s958_s14 = scalar_lea.vmem %s17_s13, 8192  ;;  %p963_p1 = scmp.lt.s32.totalorder %s17_s13, %s17_s13 }
   0x3   :  { %p959_p0 = scmp.ne.s32.totalorder %s17_s13, %s958_s14  ;;  %p964_p2 = scmp.lt.s32.totalorder %s958_s14, %s958_s14 }
   0x5   :  { %p965_p3 = por %p964_p2, %p963_p1 }
   0x7   :  { %p966_p4 = pnand %p965_p3, %p959_p0 }
   0x9   :  { %969 = shalt.err (!%p966_p4)
}
   0xa   :  { %s973_s15 = smov 64   ;;  %s974_s16 = smov 4  }
   0xb   :  { %22 = dma.hbm_to_vmem [thread:$0]  %s1029_s1, 8192, %s17_s13, [#allocation3], %s973_s15, %s973_s15, %s974_s16  }
   0xc   :  { %970 = dma.done.wait [#allocation3], 8192  }
   0xd   :  { %971 = vsyncadd [#allocation3], 4294959104  ;;  %v886_v0 = vld [vmem:[#allocation2 + $0x78] sm:$0xff]   ;;  %v890_v4 = vld [vmem:[#allocation2 + $0x70] sm:$0xff]  }
   0xe   :  { %v887_v1 = vld [vmem:[#allocation2 + $0xf8] sm:$0xff]   ;;  %795 = vmatprep.subr.bf16.mxu0 %v886_v0  ;;  %v891_v5 = vld [vmem:[#allocation2 + $0xf0] sm:$0xff]   ;;  %v894_v8 = vld [vmem:[#allocation2 + $0x68] sm:$0xff]  }
   0xf   :  { %v888_v2 = vld [vmem:[#allocation2 + $0x38] sm:$0xff]   ;;  %817 = vmatprep.subr.bf16.mxu1 %v887_v1  ;;  %v892_v6 = vld [vmem:[#allocation2 + $0x30] sm:$0xff]   ;;  %v895_v9 = vld [vmem:[#allocation2 + $0xe8] sm:$0xff]  }
  0x10   :  { %v889_v3 = vld [vmem:[#allocation2 + $0xb8] sm:$0xff]   ;;  %796 = vmatpush3.bf16.msra.mxu0 %v888_v2  ;;  %v893_v7 = vld [vmem:[#allocation2 + $0xb0] sm:$0xff]   ;;  %v896_v10 = vld [vmem:[#allocation2 + $0x28] sm:$0xff]  }
  0x11   :  { %818 = vmatpush3.bf16.msra.mxu1 %v889_v3  ;;  %797 = vmatprep.subr.bf16.mxu0 %v890_v4  ;;  %v897_v11 = vld [vmem:[#allocation2 + $0xa8] sm:$0xff]   ;;  %v898_v12 = vld [vmem:[#allocation2 + $0x60] sm:$0xff]   ;;  %v902_v16 = vld [vmem:[#allocation2 + $0x58] sm:$0xff]  }
  0x12   :  { %819 = vmatprep.subr.bf16.mxu1 %v891_v5  ;;  %v899_v13 = vld [vmem:[#allocation2 + $0xe0] sm:$0xff]   ;;  %v903_v17 = vld [vmem:[#allocation2 + $0xd8] sm:$0xff]   ;;  %v906_v20 = vld [vmem:[#allocation2 + $0x50] sm:$0xff]  }
  0x13   :  { %v900_v14 = vld [vmem:[#allocation2 + $0x20] sm:$0xff]   ;;  %v904_v18 = vld [vmem:[#allocation2 + $0x18] sm:$0xff]   ;;  %v907_v21 = vld [vmem:[#allocation2 + $0xd0] sm:$0xff]  }
  0x14   :  { %798 = vmatpush3.bf16.msra.mxu0 %v892_v6  ;;  %v901_v15 = vld [vmem:[#allocation2 + $0xa0] sm:$0xff]   ;;  %v905_v19 = vld [vmem:[#allocation2 + $0x98] sm:$0xff]   ;;  %v908_v22 = vld [vmem:[#allocation2 + $0x10] sm:$0xff]  }
  0x15   :  { %820 = vmatpush3.bf16.msra.mxu1 %v893_v7  ;;  %799 = vmatprep.subr.bf16.mxu0 %v894_v8  ;;  %v909_v23 = vld [vmem:[#allocation2 + $0x90] sm:$0xff]   ;;  %v910_v24 = vld [vmem:[#allocation2 + $0x48] sm:$0xff]   ;;  %v914_v28 = vld [vmem:[#allocation2 + $0x40] sm:$0xff]  }
  0x16   :  { %821 = vmatprep.subr.bf16.mxu1 %v895_v9  ;;  %v911_v25 = vld [vmem:[#allocation2 + $0xc8] sm:$0xff]   ;;  %v915_v29 = vld [vmem:[#allocation2 + $0xc0] sm:$0xff]   ;;  %v32_v33 = vld [vmem:[%s1028_s0 + $0x18] sm:$0xff] }
  0x17   :  { %v912_v26 = vld [vmem:[#allocation2 + $0x8] sm:$0xff]   ;;  %v916_v30 = vld [vmem:[#allocation2] sm:$0xff]   ;;  %v40_v36 = vpack.c.bf16 %v32_v33, %v32_v33  ;;  %v31_v38 = vld [vmem:[%s1028_s0 + $0x10] sm:$0xff] }
  0x18   :  { %800 = vmatpush3.bf16.msra.mxu0 %v896_v10  ;;  %v913_v27 = vld [vmem:[#allocation2 + $0x88] sm:$0xff]   ;;  %v917_v31 = vld [vmem:[#allocation2 + $0x80] sm:$0xff]   ;;  %v39_v39 = vpack.c.bf16 %v31_v38, %v31_v38  ;;  %v918_v40 = vld [vmem:[#allocation2 + $0x178] sm:$0xff]  }
  0x19   :  { %822 = vmatpush3.bf16.msra.mxu1 %v897_v11  ;;  %801 = vmatprep.subr.bf16.mxu0 %v898_v12  ;;  %v30_v32 = vld [vmem:[%s1028_s0 + $0x8] sm:$0xff]  ;;  %v29_v34 = vld [vmem:[%s1028_s0] sm:$0xff]  ;;  %v919_v41 = vld [vmem:[#allocation2 + $0x1f8] sm:$0xff]  }
  0x1a   :  { %823 = vmatprep.subr.bf16.mxu1 %v899_v13  ;;  %v38_v35 = vpack.c.bf16 %v30_v32, %v30_v32  ;;  %v37_v37 = vpack.c.bf16 %v29_v34, %v29_v34  ;;  %636 = vmatprep.mubr.bf16.mxu1 %v40_v36  ;;  %v920_v42 = vld [vmem:[#allocation2 + $0x138] sm:$0xff]   ;;  %v922_v44 = vld [vmem:[#allocation2 + $0x170] sm:$0xff]   ;;  %v926_v48 = vld [vmem:[#allocation2 + $0x168] sm:$0xff]  }
  0x1b   :  { %v921_v43 = vld [vmem:[#allocation2 + $0x1b8] sm:$0xff]   ;;  %v923_v45 = vld [vmem:[#allocation2 + $0x1f0] sm:$0xff]   ;;  %v927_v49 = vld [vmem:[#allocation2 + $0x1e8] sm:$0xff]  }
  0x1c   :  { %802 = vmatpush3.bf16.msra.mxu0 %v900_v14  ;;  %596 = vmatprep.mubr.bf16.mxu0 %v38_v35  ;;  %v924_v46 = vld [vmem:[#allocation2 + $0x130] sm:$0xff]   ;;  %v928_v50 = vld [vmem:[#allocation2 + $0x128] sm:$0xff]   ;;  %v930_v52 = vld [vmem:[#allocation2 + $0x160] sm:$0xff]  }
  0x1d   :  { %824 = vmatpush3.bf16.msra.mxu1 %v901_v15  ;;  %803 = vmatprep.subr.bf16.mxu0 %v902_v16  ;;  %v925_v47 = vld [vmem:[#allocation2 + $0x1b0] sm:$0xff]   ;;  %v929_v51 = vld [vmem:[#allocation2 + $0x1a8] sm:$0xff]   ;;  %v931_v53 = vld [vmem:[#allocation2 + $0x1e0] sm:$0xff]  }
  0x1e   :  { %825 = vmatprep.subr.bf16.mxu1 %v903_v17  ;;  %v932_v54 = vld [vmem:[#allocation2 + $0x120] sm:$0xff]   ;;  %v934_v56 = vld [vmem:[#allocation2 + $0x158] sm:$0xff]   ;;  %v938_v60 = vld [vmem:[#allocation2 + $0x150] sm:$0xff]  }
  0x1f   :  { %v933_v55 = vld [vmem:[#allocation2 + $0x1a0] sm:$0xff]   ;;  %v935_v57 = vld [vmem:[#allocation2 + $0x1d8] sm:$0xff]   ;;  %v939_v61 = vld [vmem:[#allocation2 + $0x1d0] sm:$0xff]  }
  0x20   :  { %804 = vmatpush3.bf16.msra.mxu0 %v904_v18  ;;  %v936_v58 = vld [vmem:[#allocation2 + $0x118] sm:$0xff]   ;;  %v940_v62 = vld [vmem:[#allocation2 + $0x110] sm:$0xff]   ;;  %v942_v0 = vld [vmem:[#allocation2 + $0x148] sm:$0xff]  }
  0x21   :  { %826 = vmatpush3.bf16.msra.mxu1 %v905_v19  ;;  %805 = vmatprep.subr.bf16.mxu0 %v906_v20  ;;  %v937_v59 = vld [vmem:[#allocation2 + $0x198] sm:$0xff]   ;;  %v941_v63 = vld [vmem:[#allocation2 + $0x190] sm:$0xff]   ;;  %v943_v1 = vld [vmem:[#allocation2 + $0x1c8] sm:$0xff]  }
  0x22   :  { %827 = vmatprep.subr.bf16.mxu1 %v907_v21  ;;  %v944_v2 = vld [vmem:[#allocation2 + $0x108] sm:$0xff]   ;;  %v946_v4 = vld [vmem:[#allocation2 + $0x140] sm:$0xff]   ;;  %v36_v9 = vld [vmem:[%s1028_s0 + $0x38] sm:$0xff] }
  0x23   :  { %v945_v3 = vld [vmem:[#allocation2 + $0x188] sm:$0xff]   ;;  %v947_v5 = vld [vmem:[#allocation2 + $0x1c0] sm:$0xff]   ;;  %v44_v11 = vpack.c.bf16 %v36_v9, %v36_v9  ;;  %v35_v13 = vld [vmem:[%s1028_s0 + $0x30] sm:$0xff] }
  0x24   :  { %806 = vmatpush3.bf16.msra.mxu0 %v908_v22  ;;  %v948_v6 = vld [vmem:[#allocation2 + $0x100] sm:$0xff]   ;;  %v34_v8 = vld [vmem:[%s1028_s0 + $0x28] sm:$0xff]  ;;  %v43_v15 = vpack.c.bf16 %v35_v13, %v35_v13 }
  0x25   :  { %828 = vmatpush3.bf16.msra.mxu1 %v909_v23  ;;  %807 = vmatprep.subr.bf16.mxu0 %v910_v24  ;;  %v949_v7 = vld [vmem:[#allocation2 + $0x180] sm:$0xff]   ;;  %v42_v10 = vpack.c.bf16 %v34_v8, %v34_v8 }
  0x26   :  { %829 = vmatprep.subr.bf16.mxu1 %v911_v25  ;;  %v33_v12 = vld [vmem:[%s1028_s0 + $0x20] sm:$0xff] }
  0x27   :  { %v41_v14 = vpack.c.bf16 %v33_v12, %v33_v12  ;;  %v730_v25 = vld [vmem:[%s1030_s2] ss:$0 sm:$0xff] }
  0x28   :  { %808 = vmatpush3.bf16.msra.mxu0 %v912_v26 }
  0x29   :  { %830 = vmatpush3.bf16.msra.mxu1 %v913_v27  ;;  %809 = vmatprep.subr.bf16.mxu0 %v914_v28 }
  0x2a   :  { %831 = vmatprep.subr.bf16.mxu1 %v915_v29 }
  0x2c   :  { %810 = vmatpush3.bf16.msra.mxu0 %v916_v30 }
  0x2d   :  { %832 = vmatpush3.bf16.msra.mxu1 %v917_v31  ;;  %839 = vmatprep.subr.bf16.mxu0 %v918_v40 }
  0x2e   :  { %861 = vmatprep.subr.bf16.mxu1 %v919_v41 }
  0x2f   :  { %597 = vmatmul.mubr.bf16.vlgmr.msra.gmra.mxu0 %v37_v37 }
  0x30   :  { %637 = vmatmul.mubr.bf16.vlgmr.msra.gmra.mxu1 %v39_v39  ;;  %840 = vmatpush3.bf16.msra.mxu0 %v920_v42 }
  0x31   :  { %862 = vmatpush3.bf16.msra.mxu1 %v921_v43  ;;  %841 = vmatprep.subr.bf16.mxu0 %v922_v44 }
  0x32   :  { %863 = vmatprep.subr.bf16.mxu1 %v923_v45  ;;  %676 = vmatprep.mubr.bf16.mxu0 %v42_v10 }
  0x33   :  { %716 = vmatprep.mubr.bf16.mxu1 %v44_v11 }
  0x34   :  { %842 = vmatpush3.bf16.msra.mxu0 %v924_v46 }
  0x35   :  { %864 = vmatpush3.bf16.msra.mxu1 %v925_v47  ;;  %843 = vmatprep.subr.bf16.mxu0 %v926_v48 }
  0x36   :  { %865 = vmatprep.subr.bf16.mxu1 %v927_v49 }
  0x38   :  { %844 = vmatpush3.bf16.msra.mxu0 %v928_v50 }
  0x39   :  { %866 = vmatpush3.bf16.msra.mxu1 %v929_v51  ;;  %845 = vmatprep.subr.bf16.mxu0 %v930_v52 }
  0x3a   :  { %867 = vmatprep.subr.bf16.mxu1 %v931_v53 }
  0x3c   :  { %846 = vmatpush3.bf16.msra.mxu0 %v932_v54 }
  0x3d   :  { %868 = vmatpush3.bf16.msra.mxu1 %v933_v55  ;;  %847 = vmatprep.subr.bf16.mxu0 %v934_v56 }
  0x3e   :  { %869 = vmatprep.subr.bf16.mxu1 %v935_v57 }
  0x40   :  { %848 = vmatpush3.bf16.msra.mxu0 %v936_v58 }
  0x41   :  { %870 = vmatpush3.bf16.msra.mxu1 %v937_v59  ;;  %849 = vmatprep.subr.bf16.mxu0 %v938_v60 }
  0x42   :  { %871 = vmatprep.subr.bf16.mxu1 %v939_v61 }
  0x44   :  { %850 = vmatpush3.bf16.msra.mxu0 %v940_v62 }
  0x45   :  { %872 = vmatpush3.bf16.msra.mxu1 %v941_v63  ;;  %851 = vmatprep.subr.bf16.mxu0 %v942_v0 }
  0x46   :  { %873 = vmatprep.subr.bf16.mxu1 %v943_v1 }
  0x48   :  { %852 = vmatpush3.bf16.msra.mxu0 %v944_v2 }
  0x49   :  { %874 = vmatpush3.bf16.msra.mxu1 %v945_v3  ;;  %853 = vmatprep.subr.bf16.mxu0 %v946_v4 }
  0x4a   :  { %875 = vmatprep.subr.bf16.mxu1 %v947_v5 }
  0x4c   :  { %854 = vmatpush3.bf16.msra.mxu0 %v948_v6 }
  0x4d   :  { %876 = vmatpush3.bf16.msra.mxu1 %v949_v7 }
  0x4f   :  { %677 = vmatmul.mubr.bf16.vlgmr.msra.gmra.mxu0 %v41_v14 }
  0x50   :  { %717 = vmatmul.mubr.bf16.vlgmr.msra.gmra.mxu1 %v43_v15 }
  0xef   :  { %v811_v16 = vpop.f32.mrf.mxu0 }
  0xf0   :  { %v833_v17 = vpop.f32.mrf.mxu1 }
  0xf1   :  { %v812_v18 = vpop.f32.mrf.mxu0 }
  0xf2   :  { %v834_v19 = vpop.f32.mrf.mxu1  ;;  %v813_v24 = vadd.f32 %v812_v18, %v811_v16 }
  0xf3   :  { %v814_v20 = vpop.f32.mrf.mxu0  ;;  %v835_v27 = vadd.f32 %v834_v19, %v833_v17 }
  0xf4   :  { %v836_v21 = vpop.f32.mrf.mxu1  ;;  %v599_v26 = vadd.f32 %v813_v24, %v730_v25 }
  0xf5   :  { %v815_v22 = vpop.f32.mrf.mxu0 }
  0xf6   :  { %v837_v23 = vpop.f32.mrf.mxu1  ;;  %v639_v31 = vadd.f32 %v835_v27, %v599_v26 }
 0x10f   :  { %v855_v28 = vpop.f32.mrf.mxu0 }
 0x110   :  { %v877_v29 = vpop.f32.mrf.mxu1 }
 0x111   :  { %v856_v30 = vpop.f32.mrf.mxu0 }
 0x112   :  { %v857_v32 = vadd.f32 %v856_v30, %v855_v28  ;;  %v878_v33 = vpop.f32.mrf.mxu1 }
 0x113   :  { %v858_v34 = vpop.f32.mrf.mxu0  ;;  %v879_v36 = vadd.f32 %v878_v33, %v877_v29 }
 0x114   :  { %v679_v35 = vadd.f32 %v857_v32, %v639_v31  ;;  %v880_v37 = vpop.f32.mrf.mxu1 }
 0x115   :  { %v859_v38 = vpop.f32.mrf.mxu0 }
 0x116   :  { %v719_v39 = vadd.f32 %v879_v36, %v679_v35  ;;  %v881_v40 = vpop.f32.mrf.mxu1 }
 0x118   :  { %724 = vst [vmem:[%s1031_s3] sm:$0xff] %v719_v39 }
 0x119   :  { %729 = vsyncpa [#allocation3], 1 }

</bundles_post_ra>
